<compile_context>
chip_gen: v5e
topology: v5e:2x2
jax: 0.10.0
libtpu: 0.0.40
codegen_flags: <defaults>
</compile_context>

<pallas_src>
import jax
import jax.numpy as jnp
from jax.experimental import pallas as pl
from jax.experimental.pallas import tpu as pltpu

_LANES = 128


def _make_kernel(alpha: float, m: int, tm: int, partial_last: bool):
    inv_denom = 1.0 / (alpha + 1e-4)  # fold divide into a multiply

    def _loss(x, y):
        # One shared transcendental: e = exp(-|x|).
        e = jnp.exp(-jnp.abs(x))
        # Numerically-stable BCE-with-logits (reduction='none'):
        #   max(x, 0) - x*y + log(1 + exp(-|x|))
        bce = jnp.maximum(x, 0.0) - x * y + jnp.log1p(e)
        # sigmoid(x) from the same e; reciprocal on the EUP + 1 Newton step
        # keeps full f32 accuracy while freeing the VALU slot.
        t = 1.0 + e
        r = pl.reciprocal(t, approx=True)
        r = r * (2.0 - t * r)
        p = jnp.where(x >= 0.0, r, e * r)
        dx = p - y
        alpha_factor = 1.0 - jnp.exp((dx - 1.0) * inv_denom)
        return bce * alpha_factor

    def _partial_sum(loss):
        # VPU-only partial reduction: sum the stack of (8, 128) vreg tiles.
        return loss.reshape(tm // 8, 8, _LANES).sum(axis=0)

    def kernel(pred_ref, true_ref, out_ref):
        x = pred_ref[...].astype(jnp.float32)
        y = true_ref[...].astype(jnp.float32)
        loss = _loss(x, y)

        if not partial_last:
            # Steady state: no masking anywhere.
            out_ref[...] = _partial_sum(loss)
        else:
            i = pl.program_id(0)
            last = pl.num_programs(0) - 1

            @pl.when(i != last)
            def _():
                out_ref[...] = _partial_sum(loss)

            # Only the final (partial) block pays for the row mask; rows past
            # the array end hold unspecified data and must be zeroed.
            @pl.when(i == last)
            def _():
                row = jax.lax.broadcasted_iota(jnp.int32, (tm, _LANES), 0) + i * tm
                out_ref[...] = _partial_sum(jnp.where(row < m, loss, 0.0))

    return kernel


def bce_blur_with_logits_loss(pred, true, alpha: float = 0.05, tm: int = 2048):
    """Pallas implementation of BCEBlurWithLogitsLoss.forward (returns scalar)."""
    assert pred.shape == true.shape
    total = pred.size
    assert total > 0
    # Row indices are int32: fine for any tensor below ~2^31 * 128 elements.

    pred_flat = pred.reshape(-1)
    true_flat = true.reshape(-1)

    padded_total = pl.cdiv(total, _LANES) * _LANES
    pad = padded_total - total
    if pad:
        # Rare ragged path (total not a multiple of 128): pad < 128 elements
        # with loss-neutral values (exp(-200) underflows to 0 in f32 with
        # true=1 -> loss is exactly 0), so the kernel never masks pad elements.
        # This costs one HBM copy; the common aligned case above is zero-copy.
        pred_flat = jnp.pad(pred_flat, (0, pad), constant_values=200.0)
        true_flat = jnp.pad(true_flat, (0, pad), constant_values=1.0)

    m = padded_total // _LANES
    pred2 = pred_flat.reshape(m, _LANES)
    true2 = true_flat.reshape(m, _LANES)

    # Sublane quantum: 8 rows for 4-byte dtypes, 16 for bf16/f16, 32 for 8-bit.
    min_itemsize = min(pred.dtype.itemsize, true.dtype.itemsize)
    q = max(8, 32 // min_itemsize)

    # Row tile: big enough to amortize per-step overhead, but capped so the
    # grid keeps >= ~8 steps (feeds both v7x TensorCores via "parallel").
    tm_cap = max(q, ((m // 8) // q) * q)
    tm = max(q, min((tm // q) * q, tm_cap))

    grid_m = pl.cdiv(m, tm)
    partial_last = (m % tm) != 0
    kernel = _make_kernel(alpha, m, tm, partial_last)

    n_out_rows = grid_m * 8
    bytes_per_elem = pred.dtype.itemsize + true.dtype.itemsize

    partials = pl.pallas_call(
        kernel,
        out_shape=jax.ShapeDtypeStruct((n_out_rows, _LANES), jnp.float32),
        grid=(grid_m,),
        in_specs=[
            pl.BlockSpec((tm, _LANES), lambda i: (i, 0)),
            pl.BlockSpec((tm, _LANES), lambda i: (i, 0)),
        ],
        out_specs=pl.BlockSpec((8, _LANES), lambda i: (i, 0)),
        compiler_params=pltpu.CompilerParams(
            dimension_semantics=("parallel",),
        ),
        cost_estimate=pl.CostEstimate(
            flops=16 * padded_total,
            transcendentals=4 * padded_total,
            bytes_accessed=bytes_per_elem * padded_total + 4 * n_out_rows * _LANES,
        ),
    )(pred2, true2)

    # Tiny final reduce + mean over the TRUE element count.
    return jnp.sum(partials) / jnp.float32(total)


def _reference(pred, true, alpha=0.05):
    x = pred.astype(jnp.float32)
    y = true.astype(jnp.float32)
    bce = jnp.maximum(x, 0.0) - x * y + jnp.log1p(jnp.exp(-jnp.abs(x)))
    p = jax.nn.sigmoid(x)
    dx = p - y
    loss = bce * (1.0 - jnp.exp((dx - 1.0) / (alpha + 1e-4)))
    return jnp.mean(loss)


if __name__ == "__main__":
    key = jax.random.PRNGKey(0)
    k1, k2 = jax.random.split(key)

    # Module has no learnable parameters; alpha=0.05 from __init__.
    shape = (2, 4, 16, 16)  # NCHW, 2048 elements (128-aligned -> zero-copy path)
    pred = jax.random.normal(k1, shape, dtype=jnp.float32)
    true = (jax.random.uniform(k2, shape, dtype=jnp.float32) > 0.5).astype(jnp.float32)

    out = bce_blur_with_logits_loss(pred, true, alpha=0.05)
    out = jax.block_until_ready(out)

    ref = _reference(pred, true, alpha=0.05)
    assert jnp.allclose(out, ref, rtol=1e-5, atol=1e-6), (out, ref)

    print("KERNEL_OK")
</pallas_src>

<mosaic_0001>
module attributes {stable_mosaic.version = 11 : i64} {
  func.func @kernel(%arg0: i32, %arg1: memref<8x128xf32, #tpu.memory_space<vmem>>, %arg2: memref<8x128xf32, #tpu.memory_space<vmem>>, %arg3: memref<8x128xf32, #tpu.memory_space<vmem>>) attributes {dimension_semantics = [#tpu.dimension_semantics<parallel>], iteration_bounds = array<i64: 2>, scalar_prefetch = 0 : i64, scratch_operands = 0 : i64, tpu.core_type = #tpu.core_type<tc>, window_params = [{transform_indices = @transform_0, window_bounds = array<i64: 8, 128>}, {transform_indices = @transform_1, window_bounds = array<i64: 8, 128>}, {transform_indices = @transform_2, window_bounds = array<i64: 8, 128>}]} {
    %c0 = arith.constant 0 : index
    %c0_0 = arith.constant 0 : index
    %0 = vector.load %arg1[%c0, %c0_0] : memref<8x128xf32, #tpu.memory_space<vmem>>, vector<8x128xf32>
    %c0_1 = arith.constant 0 : index
    %c0_2 = arith.constant 0 : index
    %1 = vector.load %arg2[%c0_1, %c0_2] : memref<8x128xf32, #tpu.memory_space<vmem>>, vector<8x128xf32>
    %2 = math.absf %0 : vector<8x128xf32>
    %cst = arith.constant 0.000000e+00 : f32
    %3 = vector.broadcast %cst : f32 to vector<8x128xf32>
    %4 = arith.subf %3, %2 : vector<8x128xf32>
    %5 = math.exp %4 : vector<8x128xf32>
    %cst_3 = arith.constant 0.000000e+00 : f32
    %6 = vector.broadcast %cst_3 : f32 to vector<8x128xf32>
    %7 = arith.maximumf %0, %6 : vector<8x128xf32>
    %8 = arith.mulf %0, %1 : vector<8x128xf32>
    %9 = arith.subf %7, %8 : vector<8x128xf32>
    %10 = math.log1p %5 : vector<8x128xf32>
    %11 = arith.addf %9, %10 : vector<8x128xf32>
    %cst_4 = arith.constant 1.000000e+00 : f32
    %12 = vector.broadcast %cst_4 : f32 to vector<8x128xf32>
    %13 = arith.addf %12, %5 : vector<8x128xf32>
    %14 = tpu.reciprocal %13 {approx = true} : vector<8x128xf32> -> vector<8x128xf32>
    %15 = arith.mulf %13, %14 : vector<8x128xf32>
    %cst_5 = arith.constant 2.000000e+00 : f32
    %16 = vector.broadcast %cst_5 : f32 to vector<8x128xf32>
    %17 = arith.subf %16, %15 : vector<8x128xf32>
    %18 = arith.mulf %14, %17 : vector<8x128xf32>
    %cst_6 = arith.constant 0.000000e+00 : f32
    %19 = vector.broadcast %cst_6 : f32 to vector<8x128xf32>
    %20 = arith.cmpf oge, %0, %19 : vector<8x128xf32>
    %21 = arith.mulf %5, %18 : vector<8x128xf32>
    %22 = arith.select %20, %18, %21 : vector<8x128xi1>, vector<8x128xf32>
    %23 = arith.subf %22, %1 : vector<8x128xf32>
    %cst_7 = arith.constant 1.000000e+00 : f32
    %24 = vector.broadcast %cst_7 : f32 to vector<8x128xf32>
    %25 = arith.subf %23, %24 : vector<8x128xf32>
    %cst_8 = arith.constant 19.9600792 : f32
    %26 = vector.broadcast %cst_8 : f32 to vector<8x128xf32>
    %27 = arith.mulf %25, %26 : vector<8x128xf32>
    %28 = math.exp %27 : vector<8x128xf32>
    %cst_9 = arith.constant 1.000000e+00 : f32
    %29 = vector.broadcast %cst_9 : f32 to vector<8x128xf32>
    %30 = arith.subf %29, %28 : vector<8x128xf32>
    %31 = arith.mulf %11, %30 : vector<8x128xf32>
    %32 = vector.shape_cast %31 : vector<8x128xf32> to vector<1x8x128xf32>
    %cst_10 = arith.constant dense<0.000000e+00> : vector<8x128xf32>
    %33 = vector.multi_reduction <add>, %32, %cst_10 [0] : vector<1x8x128xf32> to vector<8x128xf32>
    %c0_11 = arith.constant 0 : index
    %c0_12 = arith.constant 0 : index
    %34 = vector.load %arg3[%c0_11, %c0_12] : memref<8x128xf32, #tpu.memory_space<vmem>>, vector<8x128xf32>
    tpu.vector_store %arg3[%c0_11, %c0_12], %33 {strides = array<i32>} : memref<8x128xf32, #tpu.memory_space<vmem>>, vector<8x128xf32>,
    return
  }
  func.func @transform_0(%arg0: i32) -> (i32, i32) {
    %c0_i32 = arith.constant 0 : i32
    %c0_i32_0 = arith.constant 0 : i32
    return %arg0, %c0_i32 : i32, i32
  }
  func.func @transform_1(%arg0: i32) -> (i32, i32) {
    %c0_i32 = arith.constant 0 : i32
    %c0_i32_0 = arith.constant 0 : i32
    return %arg0, %c0_i32 : i32, i32
  }
  func.func @transform_2(%arg0: i32) -> (i32, i32) {
    %c0_i32 = arith.constant 0 : i32
    %c0_i32_0 = arith.constant 0 : i32
    return %arg0, %c0_i32 : i32, i32
  }
}

</mosaic_0001>

<bundles_post_ra>
// kernel: tpu_custom_call.1
= control target key start
LH: loop header
LB: loop body
LE: loop exit
PB: predicated region body
PF: predicated region fallthrough
CT: control target
= control target key end

     0   :  { %7 = vsyncpa [#allocation3], 0  ;;  %s732_s0 = inlined_call_operand.hbm [shape: f32[16,128], index: 0, kind: input, shape index: {}]   ;;  %s733_s1 = inlined_call_operand.hbm [shape: f32[16,128], index: 1, kind: input, shape index: {}]   ;;  %s734_s2 = inlined_call_operand.hbm [shape: f32[16,128], index: 2, kind: output, shape index: {}]  }
   0x1   :  { %9 = vsyncpa [#allocation3 + $0x1], 0 }
   0x2   :  { %10 = vsyncpa [#allocation6], 0 }
   0x3   :  { %12 = vsyncpa [#allocation6 + $0x1], 0 }
   0x4   :  { %13 = vsyncpa [#allocation4], 0 }
   0x5   :  { %15 = vsyncpa [#allocation4 + $0x1], 0  ;;  %s567_s9 = smov 0   ;;  %s569_s10 = smov 0  }
   0x6   :  { %s571_s11 = smov 0   ;;  %s573_s12 = smov 0  }
   0x7 LB: > { %s588_s13 = sadd.s32 4294967295, %s550_s12   ;;  %s345_s14 = sadd.s32 4294967294, %s550_s12   ;;  %s550_s12 = sphi %s573_s12, %s745_s12   ;;  %s546_s11 = sphi %s571_s11, %s744_s11   ;;  %s542_s10 = sphi %s569_s10, %s743_s10   ;;  %s538_s9 = sphi %s567_s9, %s742_s9  }
   0x8   : > { %s592_s15 = sadd.s32 1, %s550_s12   ;;  %s28_s16 = sadd.s32 1, %s546_s11 }
   0x9   : > { %s25_s17 = ssub.s32 %s550_s12, %s592_s15  ;;  %p35_p0 = scmp.ne.s32.totalorder %s546_s11, %s542_s10 }
   0xa   : > { %p26_p1 = scmp.eq.s32.totalorder %s25_s17, 0  ;;  %p36_p2 = scmp.eq.s32.totalorder %s550_s12, 0 }
   0xb   : > { %p41_p3 = scmp.ne.s32.totalorder %s542_s10, %s538_s9  ;;  %p42_p4 = scmp.eq.s32.totalorder %s588_s13, 0 }
   0xc   : > { %s604_s18 = scalar_select %p26_p1, %s546_s11, %s28_s16  }
   0xd   : > { %p606_p5 = por %p36_p2, %p35_p0  ;;  %p610_p6 = por %p42_p4, %p41_p3 }
   0xe   : > { %p91_p7 = scmp.eq.s32.totalorder %s588_s13, 1  ;;  %p97_p8 = scmp.eq.s32.totalorder %s345_s14, 1 }
   0xf   : > { %p378_p10 = scmp.lt.s32.totalorder %s550_s12, 2  ;;  %s626_s23 = sand.u32 1, %s546_s11  }
  0x10   : > { %p617_p11 = por %p91_p7, %p35_p0  ;;  %p621_p12 = por %p97_p8, %p41_p3 }
  0x11   : > { %s349_s24 = sshll.u32 %s550_s12, 3  ;;  %s348_s25 = sshll.u32 %s626_s23, 3 }
  0x12   : > { %s125_s28 = scalar_lea.hbm %s732_s0, %s349_s24  ;;  %s121_s30 = scalar_lea.vmem [#allocation2], %s348_s25 }
  0x13   : > { %s127_s29 = sshll.u32 %s125_s28, 4  ;;  %s129_s3 = sshll.u32 %s121_s30, 4  ;;  %s128_s29 = int_to_ptr.hbm [resolvable:$true] %s127_s29  ;;  %s130_s3 = int_to_ptr.vmem [resolvable:$true] %s129_s3 }
  0x14   : > { %p635_p13 = pnand %p378_p10, %p606_p5  ;;  %p352_p0 = scmp.ge.s32.totalorder %s550_s12, 1 }
  0x15   : > { %p153_p1 = scmp.lt.s32.totalorder %s550_s12, 3  ;;  %s118_s5 = scalar_lea.sflag [#allocation3], %s626_s23 }
  0x16   : > { %s420_s6 = sshra.s32 %s128_s29, 4  ;;  %p424_p3 = pneg %p635_p13  ;;  %s421_s6 = int_to_ptr.hbm [resolvable:$true] %s420_s6 }
  0x17   : > { %s422_s7 = scalar_lea.hbm %s421_s6, 8  ;;  %s427_s16 = scalar_lea.hbm %s732_s0, 16 }
  0x18   : > { %p423_p2 = scmp.ne.s32.totalorder %s421_s6, %s422_s7  ;;  %p428_p5 = scmp.lt.s32.totalorder %s421_s6, %s732_s0 }
  0x19   : > { %p429_p8 = scmp.lt.s32.totalorder %s427_s16, %s422_s7 }
  0x1a   : > { %p425_p4 = pnand %p424_p3, %p423_p2 }
  0x1b   : > { %p430_p10 = por %p429_p8, %p428_p5 }
  0x1c   : > { %p426_p7 = pneg %p425_p4 }
  0x1e   : > { %p431_p9 = pnand %p430_p10, %p426_p7 }
  0x20   : > { %434 = shalt.err (!%p431_p9)
}
  0x21   : > { %370 = dma.hbm_to_vmem [thread:$0]  (!%p635_p13), %s128_s29, 128, %s130_s3, %s118_s5  }
  0x22   : > { %p659_p2 = pnand %p352_p0, %p153_p1  ;;  %s144_s30 = scalar_lea.hbm %s733_s1, %s349_s24 }
  0x23   : > { %s146_s6 = sshll.u32 %s144_s30, 4  ;;  %s140_s7 = scalar_lea.vmem [#allocation5], %s348_s25  ;;  %s147_s6 = int_to_ptr.hbm [resolvable:$true] %s146_s6 }
  0x24   : > { %s148_s8 = sshll.u32 %s140_s7, 4  ;;  %s137_s14 = scalar_lea.sflag [#allocation6], %s626_s23  ;;  %s149_s8 = int_to_ptr.vmem [resolvable:$true] %s148_s8 }
  0x25   : > { %s450_s16 = sshra.s32 %s147_s6, 4  ;;  %s457_s5 = scalar_lea.hbm %s733_s1, 16  ;;  %s451_s16 = int_to_ptr.hbm [resolvable:$true] %s450_s16 }
  0x26   : > { %s452_s17 = scalar_lea.hbm %s451_s16, 8  ;;  %p458_p4 = scmp.lt.s32.totalorder %s451_s16, %s733_s1 }
  0x27   : > { %p453_p9 = scmp.ne.s32.totalorder %s451_s16, %s452_s17  ;;  %p459_p7 = scmp.lt.s32.totalorder %s457_s5, %s452_s17 }
  0x29   : > { %p455_p0 = pnand %p453_p9, %p424_p3  ;;  %p460_p5 = por %p459_p7, %p458_p4 }
  0x2b   : > { %p456_p1 = pneg %p455_p0 }
  0x2d   : > { %p461_p8 = pnand %p460_p5, %p456_p1 }
  0x2f   : > { %464 = shalt.err (!%p461_p8)
}
  0x30   : > { %373 = dma.hbm_to_vmem [thread:$0]  (!%p635_p13), %s147_s6, 128, %s149_s8, %s137_s14  }
  0x31   : > { %157 = sbr.rel (%p659_p2) target bundleno = 111 (0x6f), region = 28  ;;  %s681_s23 = sand.u32 (!%p659_p2), 1, %s542_s10  }
  0x32   : > { %s684_s25 = sshll.u32 (!%p659_p2), %s681_s23, 3  ;;  %s160_s27 = scalar_lea.sflag (!%p659_p2), [#allocation3], %s681_s23 }
  0x33   : > { %s163_s28 = scalar_lea.vmem (!%p659_p2), [#allocation2], %s684_s25 }
  0x36   : > { %525 = dma.done.wait (%p610_p6), %s160_s27, 128  }
  0x37   : > { %527 = vsyncadd (%p610_p6), %s160_s27, 4294967168  ;;  %s170_s4 = scalar_lea.sflag [#allocation6], %s681_s23  ;;  %s173_s26 = scalar_lea.vmem [#allocation5], %s684_s25 }
  0x38   : > { %529 = dma.done.wait (%p610_p6), %s170_s4, 128  }
  0x39   : > { %531 = vsyncadd (%p610_p6), %s170_s4, 4294967168  ;;  %v200_v0 = vld [vmem:[%s163_s28] sm:$0xff]  ;;  %v201_v10 = vld [vmem:[%s173_s26] sm:$0xff]  ;;  %s358_s20 = sshll.u32 %s588_s13, 3  ;;  %s199_s8 = scalar_lea.vmem [#allocation7], %s684_s25 }
  0x3a   : > { %v202_v1 = vand.u32 2147483647, %v200_v0  ;;  %vm224_vm0 = vcmp.ge.f32.partialorder %v200_v0, 0.0  ;;  %v206_v20 = vmax.f32 %v200_v0, 0.0  ;;  %v207_v21 = vmul.f32 %v201_v10, %v200_v0  ;;  %s247_s7 = scalar_lea.hbm %s734_s2, %s358_s20  ;;  %s249_s14 = sshll.u32 %s199_s8, 4  ;;  %s250_s14 = int_to_ptr.vmem [resolvable:$true] %s249_s14 }
  0x3b   : > { %s251_s16 = sshll.u32 %s247_s7, 4  ;;  %s237_s17 = scalar_lea.sflag [#allocation4], %s681_s23  ;;  %s252_s16 = int_to_ptr.hbm [resolvable:$true] %s251_s16 }
  0x3c   : > { %v203_v2 = vsub.f32 0.0, %v202_v1  ;;  %v208_v25 = vsub.f32 %v206_v20, %v207_v21  ;;  %s494_s29 = sshra.s32 %s252_s16, 4  ;;  %s500_s19 = scalar_lea.hbm %s734_s2, 16  ;;  %s495_s29 = int_to_ptr.hbm [resolvable:$true] %s494_s29 }
  0x3d   : > { %s496_s13 = scalar_lea.hbm %s495_s29, 8  ;;  %p501_p10 = scmp.lt.s32.totalorder %s495_s29, %s734_s2 }
  0x3e   : > { %v204_v3 = vmul.f32 1.442695, %v203_v2  ;;  %p497_p6 = scmp.ne.s32.totalorder %s495_s29, %s496_s13  ;;  %p502_p2 = scmp.lt.s32.totalorder %s500_s19, %s496_s13 }
  0x40   : > { %412 = vpow2.f32 %v204_v3  ;;  %p498_p13 = pnand %p497_p6, %p617_p11  ;;  %p503_p9 = por %p502_p2, %p501_p10 }
  0x42   : > { %p499_p3 = pneg %p498_p13 }
  0x44   : > { %p504_p0 = pnand %p503_p9, %p499_p3 }
  0x46   : > { %v413_v4 = vpop.eup %412 }
  0x47   : > { %v209_v5 = vadd.f32 1.0, %v413_v4  ;;  %v212_v12 = vmul.f32 -0.5, %v413_v4  ;;  %v215_v18 = vand.u32 2147483647, %v413_v4 }
  0x49   : > { %414 = vrcp.f32 %v209_v5  ;;  %v213_v15 = vadd.f32 1.0, %v212_v12  ;;  %vm216_vm1 = vcmp.lt.f32.partialorder %v215_v18, 0.0004427343 }
  0x4a   : > { %416 = vlog2.f32 %v209_v5 }
  0x4b   : > { %v214_v23 = vmul.f32 %v413_v4, %v213_v15 }
  0x4f   : > { %v415_v6 = vpop.eup %414 }
  0x50   : > { %v221_v7 = vmul.f32 %v415_v6, %v209_v5  ;;  %v417_v17 = vpop.eup %416 }
  0x51   : > { %v211_v22 = vmul.f32 0.6931472, %v417_v17 }
  0x52   : > { %v222_v8 = vsub.f32 2.0, %v221_v7 }
  0x53   : > { %v217_v26 = vsel %vm216_vm1, %v214_v23, %v211_v22 }
  0x54   : > { %v223_v9 = vmul.f32 %v415_v6, %v222_v8  ;;  %v218_v27 = vadd.f32 %v217_v26, %v208_v25 }
  0x56   : > { %v225_v11 = vmul.f32 %v413_v4, %v223_v9 }
  0x58   : > { %v226_v13 = vsel %vm224_vm0, %v223_v9, %v225_v11 }
  0x59   : > { %v227_v14 = vsub.f32 %v226_v13, %v201_v10 }
  0x5b   : > { %v356_v16 = vadd.f32 -1.0, %v227_v14 }
  0x5d   : > { %v229_v19 = vmul.f32 19.96008, %v356_v16 }
  0x5f   : > { %v230_v24 = vmul.f32 1.442695, %v229_v19 }
  0x61   : > { %418 = vpow2.f32 %v230_v24 }
  0x67   : > { %v419_v28 = vpop.eup %418 }
  0x68   : > { %v232_v29 = vsub.f32 1.0, %v419_v28 }
  0x6a   : > { %v233_v30 = vmul.f32 %v232_v29, %v218_v27 }
  0x6c   : > { %235 = vst [vmem:[%s199_s8] sm:$0xff] %v233_v30 }
  0x6d   : > { %507 = shalt.err (!%p504_p0)
}
  0x6e   : > { %365 = dma.vmem_to_hbm [thread:$0]  (%p617_p11), %s250_s14, 128, %s252_s16, %s237_s17  }
  0x6f PF: > { %s263_s23 = sand.u32 1, %s538_s9   ;;  %p741_p1 = scmp.ge.s32.totalorder %s550_s12, 2 }
  0x70   : > { %s264_s27 = scalar_lea.sflag [#allocation4], %s263_s23 }
  0x71   : > { %p375_p4 = pnand %p741_p1, %p621_p12 }
  0x73   : > { %p376_p7 = pneg %p375_p4 }
  0x75   : > { %533 = dma.done.wait (%p376_p7), %s264_s27, 128  }
  0x76   : > { %535 = vsyncadd (%p376_p7), %s264_s27, 4294967168  ;;  %p18_p5 = scmp.ge.s32.totalorder %s592_s15, 4   ;;  %s742_s9 = smov %s542_s10 }
  0x77   : > { %s743_s10 = smov %s546_s11  ;;  %s744_s11 = smov %s604_s18 }
  0x78   : > { %s745_s12 = smov %s592_s15  ;;  %20 = sbr.rel (!%p18_p5) target bundleno = 7 (0x7), region = 86 }
  0x7d   :  { %270 = vsyncpa [#allocation3], 1 }
  0x7e   :  { %272 = vsyncpa [#allocation3 + $0x1], 1 }
  0x7f   :  { %273 = vsyncpa [#allocation6], 1 }
  0x80   :  { %275 = vsyncpa [#allocation6 + $0x1], 1 }
  0x81   :  { %276 = vsyncpa [#allocation4], 1 }
  0x82   :  { %278 = vsyncpa [#allocation4 + $0x1], 1 }

</bundles_post_ra>
